<compile_context>
chip_gen: v7x
topology: tpu7x:2x2x1
jax: 0.10.0
libtpu: 0.0.40
codegen_flags: <defaults>
</compile_context>

<pallas_src>
import jax
import jax.numpy as jnp
from jax.experimental import pallas as pl
from jax.experimental.pallas import tpu as pltpu

LANE = 128          # vreg lane width: lane dims padded to multiples of this
BF16_SUBLANE = 16   # bf16 packs 16 rows per sublane group -> batch tiles rounded to 16


def _round_up(x, m):
    return ((x + m - 1) // m) * m


def _pad2d(a, rows, cols, dtype):
    """Cast to dtype and zero-pad a 2-D array up to (rows, cols)."""
    a = a.astype(dtype)
    r, c = a.shape
    if r == rows and c == cols:
        return a
    return jnp.zeros((rows, cols), dtype).at[:r, :c].set(a)


def diayn_mlp_kernel(obs_ref, w1_ref, b1_ref, w2_ref, b2_ref, w3_ref, b3_ref,
                     out_ref):
    """One batch tile of Linear -> ReLU -> Linear -> ReLU -> Linear.

    obs arrives as an unpadded f32 tile and is cast to bf16 in-kernel (VPU);
    matmuls run on the MXU in bf16 with f32 accumulation; bias add and ReLU are
    f32. Hidden/skill lane dims are 128-padded so the output store is unmasked.
    """
    x = obs_ref[...].astype(jnp.bfloat16)                                # [tb, obs_dim]

    h1 = jnp.dot(x, w1_ref[...], preferred_element_type=jnp.float32) + b1_ref[...]
    h1 = jnp.maximum(h1, 0.0).astype(jnp.bfloat16)

    h2 = jnp.dot(h1, w2_ref[...], preferred_element_type=jnp.float32) + b2_ref[...]
    h2 = jnp.maximum(h2, 0.0).astype(jnp.bfloat16)

    y = jnp.dot(h2, w3_ref[...], preferred_element_type=jnp.float32) + b3_ref[...]
    out_ref[...] = y.astype(out_ref.dtype)                               # lane-dense


def prepare_params(params):
    """One-time packing: pad hidden/skill lane dims to multiples of 128 and cast
    weights to bf16 (biases stay f32). obs_dim (the first contraction) is left
    unpadded so obs itself never needs a padding pass."""
    obs_dim, hidden_dim = params["w1"].shape
    skill_dim = params["w3"].shape[1]
    H = _round_up(hidden_dim, LANE)
    S = _round_up(skill_dim, LANE)
    return {
        "w1": _pad2d(params["w1"], obs_dim, H, jnp.bfloat16),
        "b1": _pad2d(params["b1"], 1, H, jnp.float32),
        "w2": _pad2d(params["w2"], H, H, jnp.bfloat16),
        "b2": _pad2d(params["b2"], 1, H, jnp.float32),
        "w3": _pad2d(params["w3"], H, S, jnp.bfloat16),
        "b3": _pad2d(params["b3"], 1, S, jnp.float32),
        "dims": (obs_dim, hidden_dim, skill_dim),   # original (unpadded) dims
    }


def _pick_batch_tile(B):
    if B <= 128:
        # Tiny batch: single grid step; the kernel is launch/DMA-latency bound
        # and splitting it only adds per-step overhead.
        return _round_up(B, BF16_SUBLANE)
    if B <= 2048:
        # Medium batch: exactly two balanced tiles so v7x's two TensorCores are
        # both busy (dimension_semantics=("parallel",) shards grid steps).
        return min(1024, _round_up(pl.cdiv(B, 2), BF16_SUBLANE))
    # Large batch: 512-row tiles sit near the HBM roofline on v5e/v6e/v7x and
    # give plenty of steps to shard/balance across cores.
    return 512


def diayn_forward(obs, pparams, *, batch_tile=None, out_dtype=jnp.float32,
                  unpad=True):
    """obs: [B, obs_dim] float32.  pparams: output of prepare_params.

    out_dtype=jnp.bfloat16 halves output HBM writeback; unpad=False skips the
    post-kernel skill-dim slice and returns the 128-padded slab (for consumers
    that can tolerate it)."""
    obs_dim, _, skill_dim = pparams["dims"]
    B = obs.shape[0]
    assert obs.shape[1] == obs_dim

    w1, b1 = pparams["w1"], pparams["b1"]
    w2, b2 = pparams["w2"], pparams["b2"]
    w3, b3 = pparams["w3"], pparams["b3"]
    H = w2.shape[0]
    S = w3.shape[1]

    if batch_tile is None:
        batch_tile = _pick_batch_tile(B)
    batch_tile = max(BF16_SUBLANE, _round_up(batch_tile, BF16_SUBLANE))
    grid = (pl.cdiv(B, batch_tile),)   # ragged tail handled by partial last block

    # VMEM budget: weights/biases single-buffered, obs/out double-buffered by the
    # pipeline, plus slack for intermediates. Capped at 64 MiB (v7x physical),
    # floored at the 32 MiB default so small shapes behave exactly as default.
    out_bytes = jnp.dtype(out_dtype).itemsize
    weight_vmem = (obs_dim * H + H * H + H * S) * 2 + (2 * H + S) * 4
    act_vmem = 2 * batch_tile * obs_dim * 4 + 2 * batch_tile * S * out_bytes
    interm_vmem = batch_tile * (3 * H + S) * 4
    vmem_limit = int(min(max(2 * (weight_vmem + act_vmem + interm_vmem),
                             32 * 1024 * 1024),
                         64 * 1024 * 1024))

    cost = pl.CostEstimate(
        flops=2 * B * (obs_dim * H + H * H + H * S),
        transcendentals=0,
        bytes_accessed=B * obs_dim * 4 + weight_vmem + B * S * out_bytes,
    )

    invariant = pl.Buffered(1)   # grid-invariant blocks: no double-buffering

    out = pl.pallas_call(
        diayn_mlp_kernel,
        out_shape=jax.ShapeDtypeStruct((B, S), out_dtype),
        grid_spec=pltpu.PrefetchScalarGridSpec(
            num_scalar_prefetch=0,
            grid=grid,
            in_specs=[
                # obs tile: last dim == full array dim (legal), no lane padding
                pl.BlockSpec((batch_tile, obs_dim), lambda i: (i, 0)),
                pl.BlockSpec((obs_dim, H), lambda i: (0, 0), pipeline_mode=invariant),
                pl.BlockSpec((1, H), lambda i: (0, 0), pipeline_mode=invariant),
                pl.BlockSpec((H, H), lambda i: (0, 0), pipeline_mode=invariant),
                pl.BlockSpec((1, H), lambda i: (0, 0), pipeline_mode=invariant),
                pl.BlockSpec((H, S), lambda i: (0, 0), pipeline_mode=invariant),
                pl.BlockSpec((1, S), lambda i: (0, 0), pipeline_mode=invariant),
            ],
            out_specs=pl.BlockSpec((batch_tile, S), lambda i: (i, 0)),
        ),
        compiler_params=pltpu.CompilerParams(
            dimension_semantics=("parallel",),
            vmem_limit_bytes=vmem_limit,
        ),
        cost_estimate=cost,
    )(obs, w1, b1, w2, b2, w3, b3)

    if unpad:
        return out[:, :skill_dim]   # batch dim is already exact (no batch padding)
    return out


def init_params(key, obs_dim, skill_dim, hidden_dim):
    """Deterministic synthetic init (stands in for utils.weight_init)."""
    ks = jax.random.split(key, 3)
    scale = lambda fan_in: 1.0 / jnp.sqrt(jnp.float32(fan_in))
    return {
        # stored as [in, out] (transposed vs. PyTorch's [out, in])
        "w1": jax.random.normal(ks[0], (obs_dim, hidden_dim), jnp.float32) * scale(obs_dim),
        "b1": jnp.zeros((1, hidden_dim), jnp.float32),
        "w2": jax.random.normal(ks[1], (hidden_dim, hidden_dim), jnp.float32) * scale(hidden_dim),
        "b2": jnp.zeros((1, hidden_dim), jnp.float32),
        "w3": jax.random.normal(ks[2], (hidden_dim, skill_dim), jnp.float32) * scale(hidden_dim),
        "b3": jnp.zeros((1, skill_dim), jnp.float32),
    }


def reference_forward_f32(obs, params):
    h1 = jnp.maximum(obs @ params["w1"] + params["b1"], 0.0)
    h2 = jnp.maximum(h1 @ params["w2"] + params["b2"], 0.0)
    return h2 @ params["w3"] + params["b3"]


def reference_forward_bf16(obs, params):
    """Same bf16-input / f32-accumulation path as the kernel (apples-to-apples)."""
    f = lambda a: a.astype(jnp.bfloat16)
    h1 = jnp.dot(f(obs), f(params["w1"]), preferred_element_type=jnp.float32) + params["b1"]
    h1 = jnp.maximum(h1, 0.0)
    h2 = jnp.dot(f(h1), f(params["w2"]), preferred_element_type=jnp.float32) + params["b2"]
    h2 = jnp.maximum(h2, 0.0)
    return jnp.dot(f(h2), f(params["w3"]), preferred_element_type=jnp.float32) + params["b3"]


if __name__ == "__main__":
    key = jax.random.PRNGKey(0)
    k_obs, k_obs2, k_param = jax.random.split(key, 3)

    # Small shapes consistent with the module's forward: obs [B, obs_dim]
    batch, obs_dim, skill_dim, hidden_dim = 16, 32, 16, 64

    obs = jax.random.normal(k_obs, (batch, obs_dim), jnp.float32)
    params = init_params(k_param, obs_dim, skill_dim, hidden_dim)
    pparams = prepare_params(params)

    # Default path: f32 output, skill-dim padding stripped (module semantics).
    skill_pred = jax.block_until_ready(diayn_forward(obs, pparams))
    assert skill_pred.shape == (batch, skill_dim)

    ref_bf16 = reference_forward_bf16(obs, params)
    assert jnp.allclose(skill_pred, ref_bf16, atol=5e-3, rtol=5e-3)
    ref_f32 = reference_forward_f32(obs, params)
    assert jnp.allclose(skill_pred, ref_f32, atol=1e-1, rtol=1e-1)

    # Fast output path: bf16 writeback, padded slab (no post-kernel slice pass).
    slab = jax.block_until_ready(
        diayn_forward(obs, pparams, out_dtype=jnp.bfloat16, unpad=False))
    assert slab.shape == (batch, 128)
    assert jnp.allclose(slab[:, :skill_dim].astype(jnp.float32), ref_bf16,
                        atol=3e-2, rtol=3e-2)

    # Multi-step grid + ragged tail: 300 rows -> two balanced 160-row tiles
    # (one per TensorCore on v7x); the partial last block is masked on write.
    batch2 = 300
    obs2 = jax.random.normal(k_obs2, (batch2, obs_dim), jnp.float32)
    pred2 = jax.block_until_ready(diayn_forward(obs2, pparams))
    assert pred2.shape == (batch2, skill_dim)
    assert jnp.allclose(pred2, reference_forward_bf16(obs2, params),
                        atol=5e-3, rtol=5e-3)

    print("KERNEL_OK")
</pallas_src>

<mosaic_0001>
module attributes {stable_mosaic.version = 11 : i64} {
  func.func @diayn_mlp_kernel(%arg0: i32, %arg1: memref<16x32xf32, #tpu.memory_space<vmem>>, %arg2: memref<32x128xbf16, #tpu.memory_space<vmem>>, %arg3: memref<1x128xf32, #tpu.memory_space<vmem>>, %arg4: memref<128x128xbf16, #tpu.memory_space<vmem>>, %arg5: memref<1x128xf32, #tpu.memory_space<vmem>>, %arg6: memref<128x128xbf16, #tpu.memory_space<vmem>>, %arg7: memref<1x128xf32, #tpu.memory_space<vmem>>, %arg8: memref<16x128xf32, #tpu.memory_space<vmem>>) attributes {dimension_semantics = [#tpu.dimension_semantics<parallel>], iteration_bounds = array<i64: 1>, scalar_prefetch = 0 : i64, scratch_operands = 0 : i64, tpu.core_type = #tpu.core_type<tc>, window_params = [{transform_indices = @transform_0, window_bounds = array<i64: 16, 32>}, {pipeline_mode = #tpu.pipeline_mode<synchronous>, transform_indices = @transform_1, window_bounds = array<i64: 32, 128>}, {pipeline_mode = #tpu.pipeline_mode<synchronous>, transform_indices = @transform_2, window_bounds = array<i64: 1, 128>}, {pipeline_mode = #tpu.pipeline_mode<synchronous>, transform_indices = @transform_3, window_bounds = array<i64: 128, 128>}, {pipeline_mode = #tpu.pipeline_mode<synchronous>, transform_indices = @transform_4, window_bounds = array<i64: 1, 128>}, {pipeline_mode = #tpu.pipeline_mode<synchronous>, transform_indices = @transform_5, window_bounds = array<i64: 128, 128>}, {pipeline_mode = #tpu.pipeline_mode<synchronous>, transform_indices = @transform_6, window_bounds = array<i64: 1, 128>}, {transform_indices = @transform_7, window_bounds = array<i64: 16, 128>}]} {
    %c0 = arith.constant 0 : index
    %c0_0 = arith.constant 0 : index
    %0 = vector.load %arg1[%c0, %c0_0] : memref<16x32xf32, #tpu.memory_space<vmem>>, vector<16x32xf32>
    %1 = arith.truncf %0 : vector<16x32xf32> to vector<16x32xbf16>
    %c0_1 = arith.constant 0 : index
    %c0_2 = arith.constant 0 : index
    %2 = vector.load %arg2[%c0_1, %c0_2] : memref<32x128xbf16, #tpu.memory_space<vmem>>, vector<32x128xbf16>
    %cst = arith.constant dense<0.000000e+00> : vector<16x128xf32>
    %3 = tpu.matmul %1, %2, %cst {dimension_numbers = #tpu.dot_dimension_numbers<[1], [0], [0], [1], [0, 0, 1, 1], [], []>} : vector<16x32xbf16>, vector<32x128xbf16>, vector<16x128xf32> -> vector<16x128xf32>
    %c0_3 = arith.constant 0 : index
    %c0_4 = arith.constant 0 : index
    %4 = vector.load %arg3[%c0_3, %c0_4] : memref<1x128xf32, #tpu.memory_space<vmem>>, vector<1x128xf32>
    %5 = vector.broadcast %4 : vector<1x128xf32> to vector<16x128xf32>
    %6 = arith.addf %3, %5 : vector<16x128xf32>
    %cst_5 = arith.constant 0.000000e+00 : f32
    %7 = vector.broadcast %cst_5 : f32 to vector<16x128xf32>
    %8 = arith.maximumf %6, %7 : vector<16x128xf32>
    %9 = arith.truncf %8 : vector<16x128xf32> to vector<16x128xbf16>
    %c0_6 = arith.constant 0 : index
    %c0_7 = arith.constant 0 : index
    %10 = vector.load %arg4[%c0_6, %c0_7] : memref<128x128xbf16, #tpu.memory_space<vmem>>, vector<128x128xbf16>
    %cst_8 = arith.constant dense<0.000000e+00> : vector<16x128xf32>
    %11 = tpu.matmul %9, %10, %cst_8 {dimension_numbers = #tpu.dot_dimension_numbers<[1], [0], [0], [1], [0, 0, 1, 1], [], []>} : vector<16x128xbf16>, vector<128x128xbf16>, vector<16x128xf32> -> vector<16x128xf32>
    %c0_9 = arith.constant 0 : index
    %c0_10 = arith.constant 0 : index
    %12 = vector.load %arg5[%c0_9, %c0_10] : memref<1x128xf32, #tpu.memory_space<vmem>>, vector<1x128xf32>
    %13 = vector.broadcast %12 : vector<1x128xf32> to vector<16x128xf32>
    %14 = arith.addf %11, %13 : vector<16x128xf32>
    %cst_11 = arith.constant 0.000000e+00 : f32
    %15 = vector.broadcast %cst_11 : f32 to vector<16x128xf32>
    %16 = arith.maximumf %14, %15 : vector<16x128xf32>
    %17 = arith.truncf %16 : vector<16x128xf32> to vector<16x128xbf16>
    %c0_12 = arith.constant 0 : index
    %c0_13 = arith.constant 0 : index
    %18 = vector.load %arg6[%c0_12, %c0_13] : memref<128x128xbf16, #tpu.memory_space<vmem>>, vector<128x128xbf16>
    %cst_14 = arith.constant dense<0.000000e+00> : vector<16x128xf32>
    %19 = tpu.matmul %17, %18, %cst_14 {dimension_numbers = #tpu.dot_dimension_numbers<[1], [0], [0], [1], [0, 0, 1, 1], [], []>} : vector<16x128xbf16>, vector<128x128xbf16>, vector<16x128xf32> -> vector<16x128xf32>
    %c0_15 = arith.constant 0 : index
    %c0_16 = arith.constant 0 : index
    %20 = vector.load %arg7[%c0_15, %c0_16] : memref<1x128xf32, #tpu.memory_space<vmem>>, vector<1x128xf32>
    %21 = vector.broadcast %20 : vector<1x128xf32> to vector<16x128xf32>
    %22 = arith.addf %19, %21 : vector<16x128xf32>
    %c0_17 = arith.constant 0 : index
    %c0_18 = arith.constant 0 : index
    %23 = vector.load %arg8[%c0_17, %c0_18] : memref<16x128xf32, #tpu.memory_space<vmem>>, vector<16x128xf32>
    tpu.vector_store %arg8[%c0_17, %c0_18], %22 {strides = array<i32>} : memref<16x128xf32, #tpu.memory_space<vmem>>, vector<16x128xf32>,
    return
  }
  func.func @transform_0(%arg0: i32) -> (i32, i32) {
    %c0_i32 = arith.constant 0 : i32
    %c0_i32_0 = arith.constant 0 : i32
    return %arg0, %c0_i32 : i32, i32
  }
  func.func @transform_1(%arg0: i32) -> (i32, i32) {
    %c0_i32 = arith.constant 0 : i32
    %c0_i32_0 = arith.constant 0 : i32
    %c0_i32_1 = arith.constant 0 : i32
    return %c0_i32, %c0_i32_0 : i32, i32
  }
  func.func @transform_2(%arg0: i32) -> (i32, i32) {
    %c0_i32 = arith.constant 0 : i32
    %c0_i32_0 = arith.constant 0 : i32
    %c0_i32_1 = arith.constant 0 : i32
    return %c0_i32, %c0_i32_0 : i32, i32
  }
  func.func @transform_3(%arg0: i32) -> (i32, i32) {
    %c0_i32 = arith.constant 0 : i32
    %c0_i32_0 = arith.constant 0 : i32
    %c0_i32_1 = arith.constant 0 : i32
    return %c0_i32, %c0_i32_0 : i32, i32
  }
  func.func @transform_4(%arg0: i32) -> (i32, i32) {
    %c0_i32 = arith.constant 0 : i32
    %c0_i32_0 = arith.constant 0 : i32
    %c0_i32_1 = arith.constant 0 : i32
    return %c0_i32, %c0_i32_0 : i32, i32
  }
  func.func @transform_5(%arg0: i32) -> (i32, i32) {
    %c0_i32 = arith.constant 0 : i32
    %c0_i32_0 = arith.constant 0 : i32
    %c0_i32_1 = arith.constant 0 : i32
    return %c0_i32, %c0_i32_0 : i32, i32
  }
  func.func @transform_6(%arg0: i32) -> (i32, i32) {
    %c0_i32 = arith.constant 0 : i32
    %c0_i32_0 = arith.constant 0 : i32
    %c0_i32_1 = arith.constant 0 : i32
    return %c0_i32, %c0_i32_0 : i32, i32
  }
  func.func @transform_7(%arg0: i32) -> (i32, i32) {
    %c0_i32 = arith.constant 0 : i32
    %c0_i32_0 = arith.constant 0 : i32
    return %arg0, %c0_i32 : i32, i32
  }
}

</mosaic_0001>

<bundles_post_ra>
// kernel: tpu_custom_call.1
= control target key start
LH: loop header
LB: loop body
LE: loop exit
PB: predicated region body
PF: predicated region fallthrough
CT: control target
= control target key end

     0   :  { %12 = vsyncpa [#allocation3], 0  ;;  %s809_s0 = inlined_call_operand.hbm [shape: f32[16,32], index: 0, kind: input, shape index: {}]   ;;  %s810_s1 = inlined_call_operand.hbm [shape: bf16[32,128], index: 1, kind: input, shape index: {}]   ;;  %s811_s2 = inlined_call_operand.vmem [shape: f32[1,128], index: 2, kind: input, shape index: {}]   ;;  %s812_s3 = inlined_call_operand.hbm [shape: bf16[128,128], index: 3, kind: input, shape index: {}]   ;;  %s813_s4 = inlined_call_operand.vmem [shape: f32[1,128], index: 4, kind: input, shape index: {}]   ;;  %s814_s5 = inlined_call_operand.hbm [shape: bf16[128,128], index: 5, kind: input, shape index: {}]   ;;  %s815_s6 = inlined_call_operand.vmem [shape: f32[1,128], index: 6, kind: input, shape index: {}]   ;;  %s816_s7 = inlined_call_operand.hbm [shape: f32[16,128], index: 7, kind: output, shape index: {}]  }
   0x1   :  { %13 = vsyncpa [#allocation6], 0 }
   0x2   :  { %14 = vsyncpa [#allocation9], 0 }
   0x3   :  { %15 = vsyncpa [#allocation4], 0  ;;  %s643_s24 = smov [#allocation5]   ;;  %s525_s28 = scalar_lea.hbm %s810_s1, 256 }
   0x4   :  { %s33_s25 = sshll.u32 %s643_s24, 4  ;;  %p526_p0 = scmp.ne.s32.totalorder %s810_s1, %s525_s28  ;;  %s34_s25 = int_to_ptr.vmem [resolvable:$true] %s33_s25 }
   0x5   :  { %p529_p1 = scmp.lt.u32.totalorder %s525_s28, %s810_s1 }
   0x7   :  { %p531_p2 = pnand %p529_p1, %p526_p0 }
   0x9   :  { %534 = shalt.err (!%p531_p2)
}
   0xa   :  { %s535_s10 = scalar_lea.vmem %s34_s25, 256  ;;  %p540_p4 = scmp.lt.s32.totalorder %s34_s25, %s34_s25 }
   0xb   :  { %p536_p3 = scmp.ne.s32.totalorder %s34_s25, %s535_s10  ;;  %p541_p5 = scmp.lt.s32.totalorder %s535_s10, %s535_s10 }
   0xd   :  { %p542_p6 = por %p541_p5, %p540_p4 }
   0xf   :  { %p543_p7 = pnand %p542_p6, %p536_p3 }
  0x11   :  { %546 = shalt.err (!%p543_p7)
}
  0x12   :  { %s644_s11 = smov 64   ;;  %s645_s12 = smov 4  }
  0x13   :  { %39 = dma.hbm_to_vmem [thread:$0]  %s810_s1, 256, %s34_s25, [#allocation6], %s644_s11, %s644_s11, %s645_s12  }
  0x14   :  { %s646_s15 = smov [#allocation2]   ;;  %s547_s19 = scalar_lea.hbm %s809_s0, 256 }
  0x15   :  { %s21_s16 = sshll.u32 %s646_s15, 4  ;;  %p548_p8 = scmp.ne.s32.totalorder %s809_s0, %s547_s19  ;;  %s22_s16 = int_to_ptr.vmem [resolvable:$true] %s21_s16 }
  0x16   :  { %p551_p9 = scmp.lt.u32.totalorder %s547_s19, %s809_s0 }
  0x18   :  { %p553_p10 = pnand %p551_p9, %p548_p8 }
  0x1a   :  { %556 = shalt.err (!%p553_p10)
}
  0x1b   :  { %s557_s24 = scalar_lea.vmem %s22_s16, 256  ;;  %p562_p12 = scmp.lt.s32.totalorder %s22_s16, %s22_s16 }
  0x1c   :  { %p558_p11 = scmp.ne.s32.totalorder %s22_s16, %s557_s24  ;;  %p563_p13 = scmp.lt.s32.totalorder %s557_s24, %s557_s24 }
  0x1e   :  { %p564_p0 = por %p563_p13, %p562_p12 }
  0x20   :  { %p565_p1 = pnand %p564_p0, %p558_p11 }
  0x22   :  { %568 = shalt.err (!%p565_p1)
}
  0x23   :  { %s647_s1 = smov 128   ;;  %s648_s25 = smov 8  }
  0x24   :  { %27 = dma.hbm_to_vmem [thread:$0]  %s809_s0, 256, %s22_s16, [#allocation3], %s647_s1, %s647_s1, %s648_s25  }
  0x25   :  { %s649_s28 = smov [#allocation7]   ;;  %s650_s30 = smov [#allocation8]  }
  0x26   :  { %s47_s29 = sshll.u32 %s649_s28, 4  ;;  %s61_s8 = sshll.u32 %s650_s30, 4  ;;  %s48_s29 = int_to_ptr.vmem [resolvable:$true] %s47_s29  ;;  %s724_s8 = int_to_ptr.vmem [resolvable:$true] %s61_s8 }
  0x27   :  { %s569_s13 = scalar_lea.hbm %s812_s3, 1024 }
  0x28   :  { %p570_p2 = scmp.ne.s32.totalorder %s812_s3, %s569_s13  ;;  %p573_p3 = scmp.lt.u32.totalorder %s569_s13, %s812_s3 }
  0x2a   :  { %p575_p4 = pnand %p573_p3, %p570_p2 }
  0x2c   :  { %578 = shalt.err (!%p575_p4)
}
  0x2d   :  { %s579_s0 = scalar_lea.vmem %s48_s29, 1024  ;;  %p584_p6 = scmp.lt.s32.totalorder %s48_s29, %s48_s29 }
  0x2e   :  { %p580_p5 = scmp.ne.s32.totalorder %s48_s29, %s579_s0  ;;  %p585_p7 = scmp.lt.s32.totalorder %s579_s0, %s579_s0 }
  0x30   :  { %p586_p8 = por %p585_p7, %p584_p6 }
  0x32   :  { %p587_p9 = pnand %p586_p8, %p580_p5 }
  0x34   :  { %590 = shalt.err (!%p587_p9)
}
  0x35   :  { %53 = dma.hbm_to_vmem [thread:$0]  %s812_s3, 1024, %s48_s29, [#allocation6], %s644_s11, %s644_s11, %s645_s12  }
  0x36   :  { %s591_s22 = scalar_lea.hbm %s814_s5, 1024 }
  0x37   :  { %p592_p10 = scmp.ne.s32.totalorder %s814_s5, %s591_s22  ;;  %p595_p11 = scmp.lt.u32.totalorder %s591_s22, %s814_s5 }
  0x39   :  { %p597_p12 = pnand %p595_p11, %p592_p10 }
  0x3b   :  { %600 = shalt.err (!%p597_p12)
}
  0x3c   :  { %s601_s28 = scalar_lea.vmem %s724_s8, 1024  ;;  %p606_p0 = scmp.lt.s32.totalorder %s724_s8, %s724_s8 }
  0x3d   :  { %p602_p13 = scmp.ne.s32.totalorder %s724_s8, %s601_s28  ;;  %p607_p1 = scmp.lt.s32.totalorder %s601_s28, %s601_s28 }
  0x3f   :  { %p608_p2 = por %p607_p1, %p606_p0 }
  0x41   :  { %p609_p3 = pnand %p608_p2, %p602_p13 }
  0x43   :  { %612 = shalt.err (!%p609_p3)
}
  0x44   :  { %67 = dma.hbm_to_vmem [thread:$0]  %s814_s5, 1024, %s724_s8, [#allocation9], %s644_s11, %s644_s11, %s645_s12  }
  0x45   :  { %635 = dma.done.wait [#allocation3], 256  }
  0x46   :  { %636 = vsyncadd [#allocation3], 4294967040 }
  0x47   :  { %637 = dma.done.wait [#allocation6], 1280  }
  0x48   :  { %638 = vsyncadd [#allocation6], 4294966016 }
  0x49   :  { %639 = dma.done.wait [#allocation9], 1024  }
  0x4a   :  { %640 = vsyncadd [#allocation9], 4294966272  ;;  %v651_v0 = vmov 0.0   ;;  %vm652_vm0 = vmmov 0   ;;  %v507_v1 = vld [vmem:[#allocation5] sm:$0xff]   ;;  %v508_v2 = vld [vmem:[#allocation5 + $0x8] sm:$0xff]  }
  0x4b   :  { %448 = vmatprep.subr.bf16.mxu0 %v651_v0  ;;  %452 = vmatprep.mubr.msk.bf16.mxu0 %vm652_vm0, %v651_v0  ;;  %v83_v3 = vld [vmem:[#allocation2] sm:$0xff]  ;;  %v84_v4 = vld [vmem:[#allocation2 + $0x8] sm:$0xff]  ;;  %vm109_vm1 = vcmask 261120   ;;  %v511_v8 = vld [vmem:[#allocation7 + $0x10] sm:$0xff]   ;;  %s653_s9 = smov [#allocation10]  }
  0x4c   :  { %456 = vmatprep.subr.bf16.mxu1 %v651_v0  ;;  %472 = vmatprep.mubr.msk.bf16.mxu1 %vm652_vm0, %v651_v0  ;;  %v509_v5 = vld [vmem:[#allocation7] sm:$0xff]   ;;  %v85_v6 = vpack.c.bf16 %v84_v4, %v83_v3  ;;  %v510_v7 = vld [vmem:[#allocation7 + $0x8] sm:$0xff]   ;;  %v512_v9 = vld [vmem:[#allocation7 + $0x18] sm:$0xff]   ;;  %s391_s10 = sshll.u32 %s653_s9, 4  ;;  %s392_s10 = int_to_ptr.vmem [resolvable:$true] %s391_s10 }
  0x4d   :  { %449 = vmatpush3.bf16.msra.mxu0 %v507_v1  ;;  %457 = vmatpush3.bf16.msra.mxu1 %v509_v5  ;;  %v513_v10 = vld [vmem:[#allocation7 + $0x20] sm:$0xff]   ;;  %v514_v11 = vld [vmem:[#allocation7 + $0x28] sm:$0xff]   ;;  %v515_v12 = vld [vmem:[#allocation7 + $0x30] sm:$0xff]   ;;  %p618_p5 = scmp.lt.s32.totalorder %s392_s10, %s392_s10 }
  0x4e   :  { %450 = vmatprep.subr.bf16.mxu0 %v651_v0  ;;  %458 = vmatprep.subr.bf16.mxu1 %v651_v0  ;;  %v516_v13 = vld [vmem:[#allocation7 + $0x38] sm:$0xff]   ;;  %v517_v14 = vld [vmem:[#allocation8] sm:$0xff]   ;;  %v518_v15 = vld [vmem:[#allocation8 + $0x8] sm:$0xff]  }
  0x4f   :  { %v519_v16 = vld [vmem:[#allocation8 + $0x10] sm:$0xff]   ;;  %v520_v17 = vld [vmem:[#allocation8 + $0x18] sm:$0xff]   ;;  %v521_v18 = vld [vmem:[#allocation8 + $0x20] sm:$0xff]  }
  0x50   :  { %v522_v19 = vld [vmem:[#allocation8 + $0x28] sm:$0xff]   ;;  %v405_v20 = vld [vmem:[%s811_s2] ss:$0 sm:$0xff]  ;;  %v523_v30 = vld [vmem:[#allocation8 + $0x30] sm:$0xff]  }
  0x51   :  { %451 = vmatpush3.bf16.msra.mxu0 %v508_v2  ;;  %459 = vmatpush3.bf16.msra.mxu1 %v510_v7  ;;  %v524_v31 = vld [vmem:[#allocation8 + $0x38] sm:$0xff]   ;;  %v409_v32 = vld [vmem:[%s813_s4] ss:$0 sm:$0xff]  ;;  %s613_s4 = scalar_lea.vmem %s392_s10, 256 }
  0x52   :  { %476 = vmatprep.subr.bf16.mxu0 %v651_v0  ;;  %460 = vmatprep.subr.bf16.mxu1 %v651_v0  ;;  %v418_v42 = vld [vmem:[%s815_s6] ss:$0 sm:$0xff]  ;;  %p614_p4 = scmp.ne.s32.totalorder %s392_s10, %s613_s4  ;;  %p619_p6 = scmp.lt.s32.totalorder %s613_s4, %s613_s4 }
  0x54   :  { %453 = vmatmul.mubr.msk.bf16.vlgmr.msra.gmra.mrb[0].mxu0 %vm109_vm1, %v85_v6  ;;  %p620_p7 = por %p619_p6, %p618_p5 }
  0x55   :  { %492 = vmatprep.mubr.msk.bf16.mxu0 %vm652_vm0, %v651_v0  ;;  %461 = vmatpush3.bf16.msra.mxu1 %v511_v8 }
  0x56   :  { %462 = vmatprep.subr.bf16.mxu1 %v651_v0  ;;  %477 = vmatpush3.bf16.msra.mxu0 %v517_v14  ;;  %p621_p8 = pnand %p620_p7, %p614_p4 }
  0x57   :  { %478 = vmatprep.subr.bf16.mxu0 %v651_v0 }
  0x59   :  { %463 = vmatpush3.bf16.msra.mxu1 %v512_v9 }
  0x5a   :  { %464 = vmatprep.subr.bf16.mxu1 %v651_v0  ;;  %479 = vmatpush3.bf16.msra.mxu0 %v518_v15 }
  0x5b   :  { %480 = vmatprep.subr.bf16.mxu0 %v651_v0 }
  0x5d   :  { %465 = vmatpush3.bf16.msra.mxu1 %v513_v10 }
  0x5e   :  { %466 = vmatprep.subr.bf16.mxu1 %v651_v0  ;;  %481 = vmatpush3.bf16.msra.mxu0 %v519_v16 }
  0x5f   :  { %482 = vmatprep.subr.bf16.mxu0 %v651_v0 }
  0x61   :  { %467 = vmatpush3.bf16.msra.mxu1 %v514_v11 }
  0x62   :  { %468 = vmatprep.subr.bf16.mxu1 %v651_v0  ;;  %483 = vmatpush3.bf16.msra.mxu0 %v520_v17 }
  0x63   :  { %484 = vmatprep.subr.bf16.mxu0 %v651_v0 }
  0x65   :  { %469 = vmatpush3.bf16.msra.mxu1 %v515_v12 }
  0x66   :  { %470 = vmatprep.subr.bf16.mxu1 %v651_v0  ;;  %485 = vmatpush3.bf16.msra.mxu0 %v521_v18 }
  0x67   :  { %486 = vmatprep.subr.bf16.mxu0 %v651_v0 }
  0x69   :  { %471 = vmatpush3.bf16.msra.mxu1 %v516_v13 }
  0x6a   :  { %487 = vmatpush3.bf16.msra.mxu0 %v522_v19 }
  0x6b   :  { %488 = vmatprep.subr.bf16.mxu0 %v651_v0 }
  0x6e   :  { %489 = vmatpush3.bf16.msra.mxu0 %v523_v30 }
  0x6f   :  { %490 = vmatprep.subr.bf16.mxu0 %v651_v0 }
  0x72   :  { %491 = vmatpush3.bf16.msra.mxu0 %v524_v31 }
 0x127   :  { %v147_v21 = vpop.f32.mrb[0].mxu0 }
 0x128   :  { %v148_v22 = vadd.f32 %v405_v20, %v147_v21  ;;  %v454_v23 = vpop.f32.mrb[1].mxu0 }
 0x129   :  { %v150_v24 = vpop.f32.mrb[2].mxu0 }
 0x12a   :  { %v151_v25 = vadd.f32 %v405_v20, %v150_v24  ;;  %v455_v26 = vpop.f32.mrb[3].mxu0  ;;  %v154_v27 = vmax.f32 %v148_v22, 0.0 }
 0x12c   :  { %v155_v28 = vmax.f32 %v151_v25, 0.0 }
 0x12e   :  { %v156_v29 = vpack.c.bf16 %v155_v28, %v154_v27 }
 0x130   :  { %473 = vmatmul.mubr.bf16.vlgmr.msra.gmra.mrb[0].mxu1 %v156_v29 }
 0x203   :  { %v262_v33 = vpop.f32.mrb[0].mxu1 }
 0x204   :  { %v263_v34 = vadd.f32 %v409_v32, %v262_v33  ;;  %v474_v35 = vpop.f32.mrb[1].mxu1 }
 0x205   :  { %v265_v36 = vpop.f32.mrb[2].mxu1 }
 0x206   :  { %v266_v37 = vadd.f32 %v409_v32, %v265_v36  ;;  %v475_v38 = vpop.f32.mrb[3].mxu1  ;;  %v269_v39 = vmax.f32 %v263_v34, 0.0 }
 0x208   :  { %v270_v40 = vmax.f32 %v266_v37, 0.0 }
 0x20a   :  { %v271_v41 = vpack.c.bf16 %v270_v40, %v269_v39 }
 0x20c   :  { %493 = vmatmul.mubr.bf16.vlgmr.msra.gmra.mrb[4].mxu0 %v271_v41 }
 0x2df   :  { %v377_v43 = vpop.f32.mrb[4].mxu0 }
 0x2e0   :  { %v378_v44 = vadd.f32 %v418_v42, %v377_v43  ;;  %v494_v45 = vpop.f32.mrb[5].mxu0 }
 0x2e1   :  { %v380_v46 = vpop.f32.mrb[6].mxu0 }
 0x2e2   :  { %384 = vst [vmem:[#allocation10] sm:$0xff] %v378_v44  ;;  %v381_v47 = vadd.f32 %v418_v42, %v380_v46  ;;  %v495_v48 = vpop.f32.mrb[7].mxu0 }
 0x2e4   :  { %385 = vst [vmem:[#allocation10 + $0x8] sm:$0xff] %v381_v47 }
 0x2e5   :  { %624 = shalt.err (!%p621_p8)
}
 0x2e6   :  { %s625_s14 = scalar_lea.hbm %s816_s7, 256 }
 0x2e7   :  { %p626_p9 = scmp.ne.s32.totalorder %s816_s7, %s625_s14  ;;  %p629_p10 = scmp.lt.u32.totalorder %s625_s14, %s816_s7 }
 0x2e9   :  { %p631_p11 = pnand %p629_p10, %p626_p9 }
 0x2eb   :  { %634 = shalt.err (!%p631_p11)
}
 0x2ec   :  { %397 = dma.vmem_to_hbm [thread:$0]  %s392_s10, 256, %s816_s7, [#allocation4], %s647_s1, %s647_s1, %s648_s25  }
 0x2ed   :  { %641 = dma.done.wait [#allocation4], 256  }
 0x2ee   :  { %642 = vsyncadd [#allocation4], 4294967040 }
 0x2ef   :  { %401 = vsyncpa [#allocation3], 1 }
 0x2f0   :  { %402 = vsyncpa [#allocation6], 1 }
 0x2f1   :  { %403 = vsyncpa [#allocation9], 1 }
 0x2f2   :  { %404 = vsyncpa [#allocation4], 1 }

</bundles_post_ra>
